<compile_context>
chip_gen: v6e
topology: v6e:2x2x1
jax: 0.10.0
libtpu: 0.0.40
codegen_flags: <defaults>
</compile_context>

<pallas_src>
import jax
import jax.numpy as jnp
from jax.experimental import pallas as pl
from jax.experimental.pallas import tpu as pltpu


_LANE_CHOICES = (2048, 1024, 512, 256, 128)   # lane-dense widths (mult of 128)
_TARGET_TILE_BYTES = 4 << 20                  # ~4 MiB tile -> 16 MiB pipeline
_VMEM_LIMIT_BYTES = 32 << 20                  # explicit headroom on every gen


def _swish_kernel(beta_ref, x_ref, o_ref):
    # beta_ref: (1,) scalar in SMEM; x_ref / o_ref: (TILE_M, LANES) VMEM tiles.
    beta = beta_ref[0]                       # one sld per grid step
    xf = x_ref[...].astype(jnp.float32)      # sigmoid on EUP, muls on VPU
    o_ref[...] = (xf * jax.nn.sigmoid(beta * xf)).astype(o_ref.dtype)


def swish(x, beta):
    """Swish forward: x * sigmoid(beta * x). x: any-shape array; beta: scalar."""
    orig_shape = x.shape
    total = x.size
    dtype = x.dtype

    # Adaptive lane width: biggest multiple-of-128 width that divides the
    # element count exactly (keeps stores unmasked and avoids any padding).
    lanes = None
    for cand in _LANE_CHOICES:
        if total % cand == 0:
            lanes = cand
            break
    if lanes is None:
        lanes = 128                                   # rare: total % 128 != 0
        padded_total = pl.cdiv(total, lanes) * lanes
    else:
        padded_total = total
    pad = padded_total - total
    m = padded_total // lanes

    flat = x.reshape(-1)
    if pad:
        flat = jnp.pad(flat, (0, pad))                # only when total%128 != 0
    x2d = flat.reshape(m, lanes)

    # Row tile ~_TARGET_TILE_BYTES, sublane-aligned.  The grid uses cdiv, so
    # a ragged last block is masked by Pallas on store (garbage tail reads are
    # harmless for an elementwise op) — no array-wide rounding/padding needed.
    bytes_per_row = lanes * dtype.itemsize
    tile_m = max(8, (_TARGET_TILE_BYTES // bytes_per_row) // 8 * 8)
    tile_m = min(tile_m, m)
    if tile_m >= m:
        if m >= 16:
            # Guarantee >=2 grid steps so both v7x TensorCores stream HBM.
            tile_m = max(8, (m // 2) // 8 * 8)
        else:
            tile_m = m                                # single full-extent block

    grid = pl.cdiv(m, tile_m)
    beta_arr = jnp.asarray(beta, dtype=jnp.float32).reshape(1)

    out2d = pl.pallas_call(
        _swish_kernel,
        out_shape=jax.ShapeDtypeStruct((m, lanes), dtype),
        grid_spec=pltpu.PrefetchScalarGridSpec(
            num_scalar_prefetch=0,
            grid=(grid,),
            in_specs=[
                pl.BlockSpec(memory_space=pltpu.MemorySpace.SMEM),  # beta
                pl.BlockSpec((tile_m, lanes), lambda i: (i, 0)),    # x tile
            ],
            out_specs=pl.BlockSpec((tile_m, lanes), lambda i: (i, 0)),
        ),
        compiler_params=pltpu.CompilerParams(
            dimension_semantics=("parallel",),        # shard across v7x's 2 TCs
            vmem_limit_bytes=_VMEM_LIMIT_BYTES,
        ),
    )(beta_arr, x2d)

    out_flat = out2d.reshape(-1)
    if pad:
        out_flat = out_flat[:total]
    return out_flat.reshape(orig_shape)


if __name__ == "__main__":
    key = jax.random.PRNGKey(0)

    # nn.Parameter(torch.tensor(1.0)) -> deterministic init beta = 1.0
    beta = jnp.float32(1.0)

    # Main case: NCHW input matching the module's usage.
    x = jax.random.normal(key, (2, 4, 16, 16), dtype=jnp.float32)
    out = swish(x, beta)
    jax.block_until_ready(out)
    ref = x * jax.nn.sigmoid(beta * x)
    assert out.shape == x.shape and out.dtype == x.dtype
    assert jnp.allclose(out, ref, atol=1e-6), "mismatch vs reference (aligned)"

    # Ragged case: exercises the pad / 128-lane fallback path.
    x2 = jax.random.normal(jax.random.PRNGKey(1), (3, 5, 7, 11), dtype=jnp.float32)
    out2 = swish(x2, beta)
    jax.block_until_ready(out2)
    ref2 = x2 * jax.nn.sigmoid(beta * x2)
    assert out2.shape == x2.shape and out2.dtype == x2.dtype
    assert jnp.allclose(out2, ref2, atol=1e-6), "mismatch vs reference (ragged)"

    print("KERNEL_OK")
</pallas_src>

<mosaic_0001>
module attributes {stable_mosaic.version = 11 : i64} {
  func.func @_swish_kernel(%arg0: i32, %arg1: memref<1xf32, #tpu.memory_space<smem>>, %arg2: memref<1x2048xf32, #tpu.memory_space<vmem>>, %arg3: memref<1x2048xf32, #tpu.memory_space<vmem>>) attributes {dimension_semantics = [#tpu.dimension_semantics<parallel>], iteration_bounds = array<i64: 1>, scalar_prefetch = 0 : i64, scratch_operands = 0 : i64, tpu.core_type = #tpu.core_type<tc>, window_params = [{transform_indices = @transform_0, window_bounds = array<i64: 1>}, {transform_indices = @transform_1, window_bounds = array<i64: 1, 2048>}, {transform_indices = @transform_2, window_bounds = array<i64: 1, 2048>}]} {
    %c0 = arith.constant 0 : index
    %0 = memref.load %arg1[%c0] : memref<1xf32, #tpu.memory_space<smem>>
    %c0_0 = arith.constant 0 : index
    %c0_1 = arith.constant 0 : index
    %1 = vector.load %arg2[%c0_0, %c0_1] : memref<1x2048xf32, #tpu.memory_space<vmem>>, vector<1x2048xf32>
    %2 = vector.broadcast %0 : f32 to vector<1x2048xf32>
    %3 = arith.mulf %2, %1 : vector<1x2048xf32>
    %4 = arith.negf %3 : vector<1x2048xf32>
    %5 = math.exp %4 : vector<1x2048xf32>
    %cst = arith.constant 1.000000e+00 : f32
    %6 = vector.broadcast %cst : f32 to vector<1x2048xf32>
    %7 = arith.addf %6, %5 : vector<1x2048xf32>
    %8 = arith.divf %6, %7 : vector<1x2048xf32>
    %9 = arith.mulf %1, %8 : vector<1x2048xf32>
    %c0_2 = arith.constant 0 : index
    %c0_3 = arith.constant 0 : index
    %10 = vector.load %arg3[%c0_2, %c0_3] : memref<1x2048xf32, #tpu.memory_space<vmem>>, vector<1x2048xf32>
    tpu.vector_store %arg3[%c0_2, %c0_3], %9 {strides = array<i32>} : memref<1x2048xf32, #tpu.memory_space<vmem>>, vector<1x2048xf32>,
    return
  }
  func.func @transform_0(%arg0: i32) -> i32 {
    %c0_i32 = arith.constant 0 : i32
    %c0_i32_0 = arith.constant 0 : i32
    return %c0_i32 : i32
  }
  func.func @transform_1(%arg0: i32) -> (i32, i32) {
    %c0_i32 = arith.constant 0 : i32
    %c0_i32_0 = arith.constant 0 : i32
    return %arg0, %c0_i32 : i32, i32
  }
  func.func @transform_2(%arg0: i32) -> (i32, i32) {
    %c0_i32 = arith.constant 0 : i32
    %c0_i32_0 = arith.constant 0 : i32
    return %arg0, %c0_i32 : i32, i32
  }
}

</mosaic_0001>

<bundles_post_ra>
// kernel: tpu_custom_call.1
= control target key start
LH: loop header
LB: loop body
LE: loop exit
PB: predicated region body
PF: predicated region fallthrough
CT: control target
= control target key end

     0   :  { %8 = vsyncpa [#allocation4], 0  ;;  %s144_s0 = inlined_call_operand.<no memory space> [shape: f32[1], index: 0, kind: input, shape index: {}]   ;;  %s145_s1 = inlined_call_operand.hbm [shape: f32[1,2048], index: 1, kind: input, shape index: {}]   ;;  %s146_s2 = inlined_call_operand.hbm [shape: f32[1,2048], index: 2, kind: output, shape index: {}]  }
   0x1   :  { %9 = vsyncpa [#allocation5], 0  ;;  %s118_s9 = smov [#allocation3]  }
   0x2   :  { %s18_s10 = sshll.u32 %s118_s9, 4  ;;  %s19_s10 = int_to_ptr.vmem [resolvable:$true] %s18_s10 }
   0x3   :  { %s82_s11 = scalar_lea.vmem %s19_s10, 256  ;;  %p87_p1 = scmp.lt.s32.totalorder %s19_s10, %s19_s10 }
   0x4   :  { %p83_p0 = scmp.ne.s32.totalorder %s19_s10, %s82_s11  ;;  %p88_p2 = scmp.lt.s32.totalorder %s82_s11, %s82_s11 }
   0x6   :  { %p89_p3 = por %p88_p2, %p87_p1 }
   0x8   :  { %p90_p4 = pnand %p89_p3, %p83_p0 }
   0xa   :  { %93 = shalt.err (!%p90_p4)
}
   0xb   :  { %21 = dma.hbm_to_vmem [thread:$0]  %s145_s1, 256, %s19_s10, [#allocation4]  }
   0xc   :  { %114 = dma.done.wait [#allocation4], 256  }
   0xd   :  { %115 = vsyncadd [#allocation4], 4294967040  ;;  %v28_v0 = vstv %s144_s0  ;;  %v26_v1 = vld [vmem:[#allocation3] sm:$0xff]  ;;  %v27_v2 = vld [vmem:[#allocation3 + $0x8] sm:$0xff]  ;;  %s119_s1 = smov [#allocation6]  }
   0xe   :  { %v29_v3 = vmul.f32 %v28_v0, %v26_v1  ;;  %v30_v4 = vmul.f32 %v28_v0, %v27_v2  ;;  %s53_s16 = sshll.u32 %s119_s1, 4  ;;  %s54_s16 = int_to_ptr.vmem [resolvable:$true] %s53_s16 }
   0xf   :  { %s94_s0 = scalar_lea.vmem %s54_s16, 256  ;;  %p99_p6 = scmp.lt.s32.totalorder %s54_s16, %s54_s16 }
  0x10   :  { %v62_v5 = vmul.f32 -1.442695, %v29_v3  ;;  %v63_v6 = vmul.f32 -1.442695, %v30_v4  ;;  %p95_p5 = scmp.ne.s32.totalorder %s54_s16, %s94_s0  ;;  %p100_p7 = scmp.lt.s32.totalorder %s94_s0, %s94_s0 }
  0x12   :  { %66 = vpow2.f32 %v62_v5  ;;  %p101_p8 = por %p100_p7, %p99_p6 }
  0x13   :  { %68 = vpow2.f32 %v63_v6 }
  0x14   :  { %p102_p9 = pnand %p101_p8, %p95_p5 }
  0x1f   :  { %v67_v7 = vpop.eup %66 }
  0x20   :  { %v69_v8 = vpop.eup %68  ;;  %v37_v9 = vadd.f32 1.0, %v67_v7 }
  0x21   :  { %v38_v10 = vadd.f32 1.0, %v69_v8 }
  0x22   :  { %70 = vrcp.f32 %v37_v9 }
  0x23   :  { %72 = vrcp.f32 %v38_v10 }
  0x2f   :  { %v71_v11 = vpop.eup %70 }
  0x30   :  { %v73_v12 = vpop.eup %72  ;;  %v43_v13 = vmul.f32 %v71_v11, %v26_v1 }
  0x31   :  { %v44_v14 = vmul.f32 %v73_v12, %v27_v2 }
  0x32   :  { %45 = vst [vmem:[#allocation6] sm:$0xff] %v43_v13 }
  0x33   :  { %46 = vst [vmem:[#allocation6 + $0x8] sm:$0xff] %v44_v14 }
  0x34   :  { %105 = shalt.err (!%p102_p9)
}
  0x35   :  { %56 = dma.vmem_to_hbm [thread:$0]  %s54_s16, 256, %s146_s2, [#allocation5]  }
  0x36   :  { %116 = dma.done.wait [#allocation5], 256  }
  0x37   :  { %117 = vsyncadd [#allocation5], 4294967040 }
  0x38   :  { %60 = vsyncpa [#allocation4], 1 }
  0x39   :  { %61 = vsyncpa [#allocation5], 1 }

</bundles_post_ra>
